<compile_context>
chip_gen: v5e
topology: v5e:2x2
jax: 0.10.0
libtpu: 0.0.40
codegen_flags: <defaults>
</compile_context>

<pallas_src>
import functools
import math

import jax
import jax.numpy as jnp
from jax.experimental import pallas as pl
from jax.experimental.pallas import tpu as pltpu


# ------------------------- init-time buffer (register_buffer) -------------------------

def build_pe_table(d_model: int, max_len: int = 5000, dtype=jnp.float32) -> jnp.ndarray:
    """Matches torch: pe[0,:,0::2]=sin(pos*div_term), pe[0,:,1::2]=cos(pos*div_term)."""
    position = jnp.arange(max_len, dtype=jnp.float32)[:, None]                    # (L, 1)
    div_term = jnp.exp(
        jnp.arange(0, d_model, 2, dtype=jnp.float32) * (-math.log(10000.0) / d_model)
    )                                                                             # (D/2,)
    angles = position * div_term                                                  # (L, D/2)
    pe = jnp.zeros((max_len, d_model), jnp.float32)
    pe = pe.at[:, 0::2].set(jnp.sin(angles))
    pe = pe.at[:, 1::2].set(jnp.cos(angles))
    return pe.astype(dtype)                                                       # (L, D)


# ------------------------------------ Pallas kernel ------------------------------------

def _pe_add_kernel(x_ref, pe_ref, o_ref):
    # x_ref: (TB, TC), pe_ref: (1, TC)  ->  o_ref: (TB, TC)
    # Pure VPU broadcast add over the row (batch) dim; single lane-dense store.
    o_ref[...] = (x_ref[...] + pe_ref[...]).astype(o_ref.dtype)


# --------------------------------------- tiling ----------------------------------------

def _pick_tiles(num_rows: int, cols: int, itemsize: int):
    """Lane tile = multiple of 128 (or full extent); row tile keeps the x block
    around <=4 MiB so 2x-buffered in+out stays well inside every generation's VMEM."""
    tile_c = min(cols, 2048) if cols % 128 == 0 else cols
    budget_rows = max(1, (4 * 1024 * 1024) // (tile_c * itemsize))
    if num_rows <= budget_rows:
        tile_b = num_rows                              # full extent: always layout-legal
    else:
        tile_b = min(num_rows, max(8, (budget_rows // 8) * 8))   # multiple of 8
    return tile_b, tile_c


# --------------------------------------- wrapper ---------------------------------------

@jax.jit
def positional_encoding_forward(x: jnp.ndarray, pe_flat: jnp.ndarray) -> jnp.ndarray:
    """x: (B, S, D) activations; pe_flat: (1, max_len*D) flattened precomputed buffer."""
    B, S, D = x.shape
    cols = S * D
    if cols > pe_flat.shape[-1]:
        raise ValueError(f"seq_len*d_model={cols} exceeds pe buffer {pe_flat.shape[-1]}")

    x2 = x.reshape(B, cols)                    # metadata-only (contiguous row-major)
    tile_b, tile_c = _pick_tiles(B, cols, jnp.dtype(x.dtype).itemsize)
    nb = pl.cdiv(B, tile_b)
    nc = pl.cdiv(cols, tile_c)

    out2 = pl.pallas_call(
        _pe_add_kernel,
        out_shape=jax.ShapeDtypeStruct((B, cols), x.dtype),
        grid=(nc, nb),                                    # cols outer, rows inner:
        in_specs=[                                        # pe block resident over rows
            pl.BlockSpec((tile_b, tile_c), lambda j, i: (i, j)),
            pl.BlockSpec((1, tile_c), lambda j, i: (0, j)),   # selects first S*D elems
        ],
        out_specs=pl.BlockSpec((tile_b, tile_c), lambda j, i: (i, j)),
        input_output_aliases={0: 0},                      # in-place-compatible add
        compiler_params=pltpu.CompilerParams(
            dimension_semantics=("parallel", "parallel"),
            vmem_limit_bytes=32 * 1024 * 1024,
        ),
    )(x2, pe_flat)

    # TODO(synk): nn.Dropout(p=0.1) is identity at inference; training-mode dropout RNG
    # (pltpu.prng_seed + bernoulli mask) is not replicated here.
    return out2.reshape(B, S, D)


# ------------------------------- pure-JAX reference (check) ----------------------------

def reference_forward(x, pe_table):
    S = x.shape[1]
    return x + pe_table[None, :S, :]


# ------------------------------------------ main ---------------------------------------

if __name__ == "__main__":
    # Shapes consistent with the car_foundation usage of this module:
    #   d_model = 32, seq = 8, batch = 2, max_len = 5000 (torch default).
    D_MODEL = 32
    MAX_LEN = 5000
    BATCH, SEQ = 2, 8

    key = jax.random.PRNGKey(0)
    x = jax.random.normal(key, (BATCH, SEQ, D_MODEL), jnp.float32)

    # register_buffer equivalent — built once at init, stored flattened for the kernel.
    pe_table = build_pe_table(D_MODEL, MAX_LEN, dtype=x.dtype)        # (max_len, D)
    pe_flat = pe_table.reshape(1, MAX_LEN * D_MODEL)                  # (1, max_len*D)

    out = jax.block_until_ready(positional_encoding_forward(x, pe_flat))
    ref = jax.block_until_ready(reference_forward(x, pe_table))

    assert out.shape == (BATCH, SEQ, D_MODEL), out.shape
    assert bool(jnp.all(jnp.isfinite(out)))
    assert bool(jnp.allclose(out, ref, atol=1e-6, rtol=1e-6)), (out, ref)

    print("KERNEL_OK")
</pallas_src>

<mosaic_0001>
module attributes {stable_mosaic.version = 11 : i64} {
  func.func @_pe_add_kernel(%arg0: i32, %arg1: i32, %arg2: memref<2x256xf32, #tpu.memory_space<vmem>>, %arg3: memref<1x256xf32, #tpu.memory_space<vmem>>, %arg4: memref<2x256xf32, #tpu.memory_space<vmem>>) attributes {dimension_semantics = [#tpu.dimension_semantics<parallel>, #tpu.dimension_semantics<parallel>], iteration_bounds = array<i64: 1, 1>, scalar_prefetch = 0 : i64, scratch_operands = 0 : i64, tpu.core_type = #tpu.core_type<tc>, window_params = [{transform_indices = @transform_0, window_bounds = array<i64: 2, 256>}, {transform_indices = @transform_1, window_bounds = array<i64: 1, 256>}, {transform_indices = @transform_2, window_bounds = array<i64: 2, 256>}]} {
    %c0 = arith.constant 0 : index
    %c0_0 = arith.constant 0 : index
    %0 = vector.load %arg2[%c0, %c0_0] : memref<2x256xf32, #tpu.memory_space<vmem>>, vector<2x256xf32>
    %c0_1 = arith.constant 0 : index
    %c0_2 = arith.constant 0 : index
    %1 = vector.load %arg3[%c0_1, %c0_2] : memref<1x256xf32, #tpu.memory_space<vmem>>, vector<1x256xf32>
    %2 = vector.broadcast %1 : vector<1x256xf32> to vector<2x256xf32>
    %3 = arith.addf %0, %2 : vector<2x256xf32>
    %c0_3 = arith.constant 0 : index
    %c0_4 = arith.constant 0 : index
    %4 = vector.load %arg4[%c0_3, %c0_4] : memref<2x256xf32, #tpu.memory_space<vmem>>, vector<2x256xf32>
    tpu.vector_store %arg4[%c0_3, %c0_4], %3 {strides = array<i32>} : memref<2x256xf32, #tpu.memory_space<vmem>>, vector<2x256xf32>,
    return
  }
  func.func @transform_0(%arg0: i32, %arg1: i32) -> (i32, i32) {
    %c0_i32 = arith.constant 0 : i32
    return %arg1, %arg0 : i32, i32
  }
  func.func @transform_1(%arg0: i32, %arg1: i32) -> (i32, i32) {
    %c0_i32 = arith.constant 0 : i32
    %c0_i32_0 = arith.constant 0 : i32
    return %c0_i32, %arg0 : i32, i32
  }
  func.func @transform_2(%arg0: i32, %arg1: i32) -> (i32, i32) {
    %c0_i32 = arith.constant 0 : i32
    return %arg1, %arg0 : i32, i32
  }
}

</mosaic_0001>

<bundles_post_ra>
// kernel: positional_encoding_forward.1
= control target key start
LH: loop header
LB: loop body
LE: loop exit
PB: predicated region body
PF: predicated region fallthrough
CT: control target
= control target key end

     0   :  { %7 = vsyncpa [#allocation3], 0  ;;  %s68_s12 = smov [#allocation2]   ;;  %s93_s0 = inlined_call_operand.vmem [shape: f32[2,256], index: 0, kind: input, shape index: {}, may-alias: {0,2}]   ;;  %s94_s1 = inlined_call_operand.hbm [shape: f32[1,160000], index: 1, kind: input, shape index: {}]   ;;  %s95_s2 = inlined_call_operand.vmem [shape: f32[2,256], index: 2, kind: output, shape index: {}, may-alias: {0,2}]  }
   0x1   :  { %s15_s11 = sshll.u32 %s94_s1, 4  ;;  %s17_s13 = sshll.u32 %s68_s12, 4  ;;  %s16_s11 = int_to_ptr.hbm [resolvable:$true] %s15_s11  ;;  %s18_s13 = int_to_ptr.vmem [resolvable:$true] %s17_s13 }
   0x2   :  { %20 = dma.hbm_to_vmem [thread:$0]  %s16_s11, 32, %s18_s13, [#allocation3]  }
   0x3   :  { %66 = dma.done.wait [#allocation3], 32  }
   0x4   :  { %67 = vsyncadd [#allocation3], 4294967264  ;;  %v26_v0 = vld [vmem:[#allocation2] sm:$0x3]  ;;  %vm31_vm0 = vcmask 1041408  }
   0x5   :  { %v28_v1 = vperm.slane %v26_v0, 0  ;;  %v29_v2 = vperm.slane %v26_v0, 1  ;;  %v25_v3 = vld [vmem:[%s93_s0] sm:$0xf] }
   0x7   :  { %v30_v4 = vrot.slane %v29_v2, 6 }
   0x9   :  { %v32_v5 = vsel %vm31_vm0, %v28_v1, %v30_v4 }
   0xa   :  { %v34_v6 = vadd.f32 %v32_v5, %v25_v3 }
   0xc   :  { %35 = vst [vmem:[%s95_s2] sm:$0xf] %v34_v6 }
   0xd   :  { %40 = vsyncpa [#allocation3], 1 }

</bundles_post_ra>
